<compile_context>
chip_gen: v5e
topology: v5e:2x2
jax: 0.10.0
libtpu: 0.0.40
codegen_flags: <defaults>
</compile_context>

<pallas_src>
import functools

import jax
import jax.numpy as jnp
from jax.experimental import pallas as pl
from jax.experimental.pallas import tpu as pltpu


def _round_up(x, m):
    return ((x + m - 1) // m) * m


def _vmem_capacity_bytes():
    """Physical VMEM per core; used for generation-aware tiles and limits."""
    try:
        return int(pltpu.get_tpu_info().vmem_capacity_bytes)
    except Exception:
        return 64 * 1024 * 1024  # conservative fallback (v7x per-TC)


def _pick_tiles(M, N, K, in_itemsize):
    """Dtype- and generation-aware tile defaults.

    tk does not change HBM traffic (A/B stream over all of K regardless); only
    tm/tn set the re-read factor (arithmetic intensity ~ tm*tn/(tm+tn)), so
    VMEM goes into tm/tn and tk stays at a moderate 512.
    Dims smaller than the default use the full extent (single block, always
    layout-legal since block dim == array dim, and no out-of-bounds reads).
    """
    big_vmem = _vmem_capacity_bytes() >= 96 * 1024 * 1024  # v5e/v6e: 128 MiB, v7x: 64 MiB
    if in_itemsize < 4:          # bf16 / fp8 / int8: push arithmetic intensity
        d_mn = 2048 if big_vmem else 1024
    else:                        # f32
        d_mn = 1024 if big_vmem else 512
    d_k = 512
    tm = M if M <= d_mn else d_mn
    tn = N if N <= d_mn else d_mn
    tk = K if K <= d_k else d_k
    return tm, tn, tk


def _matmul_kernel_direct(a_ref, b_ref, o_ref, *, acc_dtype):
    # NOTE: valid only because the output BlockSpec ignores the K grid axis and
    # K is the innermost "arbitrary" axis -- o_ref stays VMEM-resident across
    # the K loop, so we accumulate directly into it (no scratch, no final copy).
    @pl.when(pl.program_id(2) == 0)
    def _():
        o_ref[...] = jnp.zeros_like(o_ref)

    o_ref[...] += jnp.dot(a_ref[...], b_ref[...], preferred_element_type=acc_dtype)


def _matmul_kernel_scratch(a_ref, b_ref, o_ref, acc_ref, *, acc_dtype):
    # Output dtype narrower than the accumulator: accumulate in acc_ref
    # (f32 for floats, int32 for ints) and cast once on the last K step.
    @pl.when(pl.program_id(2) == 0)
    def _():
        acc_ref[...] = jnp.zeros_like(acc_ref)

    acc_ref[...] += jnp.dot(a_ref[...], b_ref[...], preferred_element_type=acc_dtype)

    @pl.when(pl.program_id(2) == pl.num_programs(2) - 1)
    def _():
        o_ref[...] = acc_ref[...].astype(o_ref.dtype)


def matmul(a, b, *, tm=None, tn=None, tk=None):
    M, K = a.shape
    K2, N = b.shape
    assert K == K2, "inner dimensions must match"

    out_dtype = jnp.result_type(a.dtype, b.dtype)
    # Integer inputs accumulate natively in int32 (v5e/v6e int MXU path,
    # matches integer matmul semantics); floats accumulate in f32.
    acc_dtype = jnp.int32 if jnp.issubdtype(out_dtype, jnp.integer) else jnp.float32
    direct = jnp.dtype(out_dtype) == jnp.dtype(acc_dtype)

    in_itemsize = min(jnp.dtype(a.dtype).itemsize, jnp.dtype(b.dtype).itemsize)
    dtm, dtn, dtk = _pick_tiles(M, N, K, in_itemsize)
    tm = dtm if tm is None else tm
    tn = dtn if tn is None else tn
    tk = dtk if tk is None else tk

    # Only K needs zero-padding (reduction correctness).  Ragged M/N edge
    # blocks are handled by Pallas' masked edge stores: out-of-bounds rows of A
    # / cols of B only contribute to output elements that are never written.
    Kp = K
    if K % tk != 0:
        Kp = _round_up(K, tk)
        a = jnp.pad(a, ((0, 0), (0, Kp - K)))
        b = jnp.pad(b, ((0, Kp - K), (0, 0)))

    grid = (pl.cdiv(M, tm), pl.cdiv(N, tn), Kp // tk)

    if direct:
        kernel = functools.partial(_matmul_kernel_direct, acc_dtype=acc_dtype)
        scratch = []
    else:
        kernel = functools.partial(_matmul_kernel_scratch, acc_dtype=acc_dtype)
        scratch = [pltpu.VMEM((tm, tn), acc_dtype)]

    es = lambda dt: jnp.dtype(dt).itemsize
    # Double-buffered input/output blocks (+ accumulator scratch when used).
    vmem_est = 2 * (
        tm * tk * es(a.dtype) + tk * tn * es(b.dtype) + tm * tn * es(out_dtype)
    ) + (0 if direct else tm * tn * es(acc_dtype))

    extra_params = {}
    if vmem_est > 16 * 1024 * 1024:  # past v5e's 16 MiB default scoped limit
        cap = int(_vmem_capacity_bytes() * 0.75)  # generation-aware ceiling
        extra_params["vmem_limit_bytes"] = int(min(vmem_est * 1.5, cap))

    gm, gn, _ = grid
    cost = pl.CostEstimate(
        flops=2 * M * N * K,
        transcendentals=0,
        # Include the tiling re-read factor: A is streamed once per N-tile,
        # B once per M-tile.
        bytes_accessed=int(
            gn * M * Kp * es(a.dtype) + gm * Kp * N * es(b.dtype) + M * N * es(out_dtype)
        ),
    )

    # TODO(synk): skinny matmuls (grid_m * grid_n == 1 with huge K) cannot use
    # both v7x TensorCores under ("parallel","parallel","arbitrary") sharding;
    # a K-split with a small post-sum would recover ~2x in that corner case.
    return pl.pallas_call(
        kernel,
        out_shape=jax.ShapeDtypeStruct((M, N), out_dtype),
        grid_spec=pltpu.PrefetchScalarGridSpec(
            num_scalar_prefetch=0,
            grid=grid,
            in_specs=[
                pl.BlockSpec((tm, tk), lambda i, j, k: (i, k)),
                pl.BlockSpec((tk, tn), lambda i, j, k: (k, j)),
            ],
            out_specs=pl.BlockSpec((tm, tn), lambda i, j, k: (i, j)),
            scratch_shapes=scratch,
        ),
        compiler_params=pltpu.CompilerParams(
            dimension_semantics=("parallel", "parallel", "arbitrary"),
            **extra_params,
        ),
        cost_estimate=cost,
    )(a, b)


def net_matmul_forward(inputs):
    # Mirrors: torch.matmul(inputs[0], inputs[1]) for 2-D operands.
    return matmul(inputs[0], inputs[1])


if __name__ == "__main__":
    key = jax.random.PRNGKey(0)
    k1, k2, k3, k4 = jax.random.split(key, 4)

    # f32 path (direct accumulation into the VMEM-resident output block).
    M, K, N = 8, 32, 16
    a = jax.random.normal(k1, (M, K), dtype=jnp.float32)
    b = jax.random.normal(k2, (K, N), dtype=jnp.float32)
    out = net_matmul_forward([a, b])
    jax.block_until_ready(out)
    ref = jnp.matmul(a, b)
    assert out.shape == (M, N)
    assert jnp.allclose(out, ref, atol=1e-5, rtol=1e-5)

    # bf16 path (f32 scratch accumulator, single cast on the last K step).
    M2, K2, N2 = 16, 64, 128
    a2 = jax.random.normal(k3, (M2, K2), dtype=jnp.bfloat16)
    b2 = jax.random.normal(k4, (K2, N2), dtype=jnp.bfloat16)
    out2 = net_matmul_forward([a2, b2])
    jax.block_until_ready(out2)
    ref2 = jnp.matmul(a2.astype(jnp.float32), b2.astype(jnp.float32))
    assert out2.shape == (M2, N2) and out2.dtype == jnp.bfloat16
    assert jnp.allclose(out2.astype(jnp.float32), ref2, atol=1e-1, rtol=5e-2)

    print("KERNEL_OK")
</pallas_src>

<mosaic_0001>
module attributes {stable_mosaic.version = 11 : i64} {
  func.func @_matmul_kernel_direct(%arg0: i32, %arg1: i32, %arg2: i32, %arg3: memref<8x32xf32, #tpu.memory_space<vmem>>, %arg4: memref<32x16xf32, #tpu.memory_space<vmem>>, %arg5: memref<8x16xf32, #tpu.memory_space<vmem>>) attributes {dimension_semantics = [#tpu.dimension_semantics<parallel>, #tpu.dimension_semantics<parallel>, #tpu.dimension_semantics<arbitrary>], iteration_bounds = array<i64: 1, 1, 1>, scalar_prefetch = 0 : i64, scratch_operands = 0 : i64, tpu.core_type = #tpu.core_type<tc>, window_params = [{transform_indices = @transform_0, window_bounds = array<i64: 8, 32>}, {transform_indices = @transform_1, window_bounds = array<i64: 32, 16>}, {transform_indices = @transform_2, window_bounds = array<i64: 8, 16>}]} {
    %c0_i32 = arith.constant 0 : i32
    %0 = arith.cmpi eq, %arg2, %c0_i32 : i32
    %1 = arith.extui %0 : i1 to i32
    %c0_i32_0 = arith.constant 0 : i32
    %2 = arith.cmpi ne, %1, %c0_i32_0 : i32
    scf.if %2 {
      %cst_8 = arith.constant 0.000000e+00 : f32
      %9 = vector.broadcast %cst_8 : f32 to vector<8x16xf32>
      %c0_9 = arith.constant 0 : index
      %c0_10 = arith.constant 0 : index
      %10 = vector.load %arg5[%c0_9, %c0_10] : memref<8x16xf32, #tpu.memory_space<vmem>>, vector<8x16xf32>
      tpu.vector_store %arg5[%c0_9, %c0_10], %9 {strides = array<i32>} : memref<8x16xf32, #tpu.memory_space<vmem>>, vector<8x16xf32>,
    } else {
    }
    %c0 = arith.constant 0 : index
    %c0_1 = arith.constant 0 : index
    %3 = vector.load %arg5[%c0, %c0_1] : memref<8x16xf32, #tpu.memory_space<vmem>>, vector<8x16xf32>
    %c0_2 = arith.constant 0 : index
    %c0_3 = arith.constant 0 : index
    %4 = vector.load %arg3[%c0_2, %c0_3] : memref<8x32xf32, #tpu.memory_space<vmem>>, vector<8x32xf32>
    %c0_4 = arith.constant 0 : index
    %c0_5 = arith.constant 0 : index
    %5 = vector.load %arg4[%c0_4, %c0_5] : memref<32x16xf32, #tpu.memory_space<vmem>>, vector<32x16xf32>
    %cst = arith.constant dense<0.000000e+00> : vector<8x16xf32>
    %6 = tpu.matmul %4, %5, %cst {dimension_numbers = #tpu.dot_dimension_numbers<[1], [0], [0], [1], [0, 0, 1, 1], [], []>} : vector<8x32xf32>, vector<32x16xf32>, vector<8x16xf32> -> vector<8x16xf32>
    %7 = arith.addf %3, %6 : vector<8x16xf32>
    %c0_6 = arith.constant 0 : index
    %c0_7 = arith.constant 0 : index
    %8 = vector.load %arg5[%c0_6, %c0_7] : memref<8x16xf32, #tpu.memory_space<vmem>>, vector<8x16xf32>
    tpu.vector_store %arg5[%c0_6, %c0_7], %7 {strides = array<i32>} : memref<8x16xf32, #tpu.memory_space<vmem>>, vector<8x16xf32>,
    return
  }
  func.func @transform_0(%arg0: i32, %arg1: i32, %arg2: i32) -> (i32, i32) {
    %c0_i32 = arith.constant 0 : i32
    return %arg0, %arg2 : i32, i32
  }
  func.func @transform_1(%arg0: i32, %arg1: i32, %arg2: i32) -> (i32, i32) {
    %c0_i32 = arith.constant 0 : i32
    return %arg2, %arg1 : i32, i32
  }
  func.func @transform_2(%arg0: i32, %arg1: i32, %arg2: i32) -> (i32, i32) {
    %c0_i32 = arith.constant 0 : i32
    return %arg0, %arg1 : i32, i32
  }
}

</mosaic_0001>

<bundles_post_ra>
// kernel: tpu_custom_call.1
= control target key start
LH: loop header
LB: loop body
LE: loop exit
PB: predicated region body
PF: predicated region fallthrough
CT: control target
= control target key end

     0   :  { %vm16_vm0 = vcmask 130048   ;;  %v96_v2 = vmov 0.0   ;;  %s133_s0 = inlined_call_operand.vmem [shape: f32[8,32], index: 0, kind: input, shape index: {}]   ;;  %s134_s1 = inlined_call_operand.vmem [shape: f32[32,16], index: 1, kind: input, shape index: {}]   ;;  %s135_s2 = inlined_call_operand.hbm [shape: f32[8,16], index: 2, kind: output, shape index: {}]  }
   0x1   :  { %v23_v0 = vld [vmem:[%s134_s1 + $0x18] sm:$0xff]  ;;  %v22_v1 = vld [vmem:[%s134_s1 + $0x10] sm:$0xff]  ;;  %17 = vst.msk [vmem:[#allocation2] sm:$0xff] %vm16_vm0, %v96_v2 }
   0x2   :  { %40 = vmatpush.msra.mxu0 %v23_v0 }
   0x3   :  { %7 = vsyncpa [#allocation3], 0  ;;  %v21_v3 = vld [vmem:[%s134_s1 + $0x8] sm:$0xff]  ;;  %v20_v4 = vld [vmem:[%s134_s1] sm:$0xff]  ;;  %vm24_vm1 = vcmask 261120   ;;  %s97_s19 = smov [#allocation2]  }
   0x4   :  { %41 = vmatpush.msra.mxu0 %v22_v1  ;;  %v19_v5 = vld [vmem:[%s133_s0] sm:$0xff]  ;;  %s56_s20 = sshll.u32 %s97_s19, 4  ;;  %s58_s23 = sshll.u32 %s135_s2, 4  ;;  %s57_s20 = int_to_ptr.vmem [resolvable:$true] %s56_s20  ;;  %s59_s23 = int_to_ptr.hbm [resolvable:$true] %s58_s23 }
   0x6   :  { %42 = vmatpush.msra.mxu0 %v21_v3 }
   0x8   :  { %43 = vmatpush.msra.mxu0 %v20_v4  ;;  %v18_v6 = vld [vmem:[#allocation2] sm:$0xff] }
   0x9   :  { %67 = vmatmul.msk.f32.vlgmr.msra.gmra.mxu0 %vm24_vm1, %v19_v5 }
  0x86   :  { %v45_v7 = vpop.f32.mrf.mxu0 }
  0x87   :  { %v48_v8 = vadd.f32 %v45_v7, %v18_v6 }
  0x89   :  { %50 = vst.msk [vmem:[#allocation2] sm:$0xff] %vm16_vm0, %v48_v8 }
  0x8a   :  { %61 = dma.vmem_to_hbm [thread:$0]  %s57_s20, 128, %s59_s23, [#allocation3]  }
  0x8b   :  { %94 = dma.done.wait [#allocation3], 128  }
  0x8c   :  { %95 = vsyncadd [#allocation3], 4294967168 }
  0x8d   :  { %66 = vsyncpa [#allocation3], 1 }

</bundles_post_ra>
